<compile_context>
chip_gen: v5e
topology: v5e:2x2
jax: 0.10.0
libtpu: 0.0.40
codegen_flags: <defaults>
</compile_context>

<pallas_src>
import jax
import jax.numpy as jnp
from jax import lax
from jax.experimental import pallas as pl
from jax.experimental.pallas import tpu as pltpu


def _round_up(v, m):
    return ((v + m - 1) // m) * m


def _linear_kernel(x_ref, w_ref, b_ref, o_ref, acc_ref):
    # x_ref:   (tm, tk)   row tile of flattened inputs
    # w_ref:   (tn, tk)   weight tile in PyTorch layout (text_size, mm_size)
    # b_ref:   (1, tn)    bias tile
    # o_ref:   (tm, tn)   output tile
    # acc_ref: (tm, tn)   f32 accumulator (persists across the K grid axis)
    k = pl.program_id(2)

    @pl.when(k == 0)
    def _():
        acc_ref[...] = jnp.zeros_like(acc_ref)

    # Contract last dim of x with last dim of w: (tm, tk) x (tn, tk) -> (tm, tn).
    acc_ref[...] += lax.dot_general(
        x_ref[...], w_ref[...],
        dimension_numbers=(((1,), (1,)), ((), ())),
        preferred_element_type=jnp.float32)

    @pl.when(k == pl.num_programs(2) - 1)
    def _():
        o_ref[...] = (acc_ref[...] + b_ref[...].astype(jnp.float32)).astype(o_ref.dtype)


def _pick_tiles(M, K, N):
    # M tile: up to 256, padded to a multiple of 8 (sublane alignment).
    tm = 256 if M >= 256 else _round_up(max(M, 1), 8)
    # N tile: multiples of 128 keep output stores lane-dense; fall back to
    # the full dimension when text_size is not 128-aligned (valid BlockSpec).
    if N <= 256:
        tn = N
    elif N % 256 == 0:
        tn = 256
    elif N % 128 == 0:
        tn = 128
    else:
        tn = N
    # K tile: 512-deep contractions when mm_size divides evenly, else full K.
    if K > 512 and K % 512 == 0:
        tk = 512
    else:
        tk = K
    return tm, tn, tk


def naive_linear(x, weight, bias):
    """Pallas equivalent of nn.Linear(mm_size, text_size)(x).

    x:      (..., mm_size)
    weight: (text_size, mm_size)   -- PyTorch nn.Linear convention (NOT transposed here)
    bias:   (text_size,)
    returns (..., text_size)
    """
    mm_size = x.shape[-1]
    text_size = weight.shape[0]
    lead_shape = x.shape[:-1]

    x2d = x.reshape(-1, mm_size)
    M, K, N = x2d.shape[0], mm_size, text_size

    tm, tn, tk = _pick_tiles(M, K, N)

    # Pad rows up to a multiple of the row tile (cheap HBM copy, keeps big tiles).
    M_pad = _round_up(M, tm)
    if M_pad != M:
        x2d = jnp.pad(x2d, ((0, M_pad - M), (0, 0)))

    b2d = bias.reshape(1, N)

    grid = (M_pad // tm, N // tn, K // tk)

    # VMEM budget: double-buffered x/w/b/out tiles + the f32 accumulator.
    itemsize = jnp.dtype(x.dtype).itemsize
    vmem_est = 2 * (tm * tk + tn * tk + tm * tn + tn) * itemsize + tm * tn * 4
    vmem_limit = int(min(max(2 * vmem_est, 32 * 1024 * 1024), 96 * 1024 * 1024))

    cost = pl.CostEstimate(
        flops=2 * M * K * N,
        transcendentals=0,
        bytes_accessed=(M * K + N * K + N + M * N) * itemsize,
    )

    out2d = pl.pallas_call(
        _linear_kernel,
        out_shape=jax.ShapeDtypeStruct((M_pad, N), x.dtype),
        grid_spec=pltpu.PrefetchScalarGridSpec(
            num_scalar_prefetch=0,
            grid=grid,
            in_specs=[
                pl.BlockSpec((tm, tk), lambda i, j, k: (i, k)),   # x rows
                pl.BlockSpec((tn, tk), lambda i, j, k: (j, k)),   # weight (N, K)
                pl.BlockSpec((1, tn), lambda i, j, k: (0, j)),    # bias
            ],
            out_specs=pl.BlockSpec((tm, tn), lambda i, j, k: (i, j)),
            scratch_shapes=[pltpu.VMEM((tm, tn), jnp.float32)],
        ),
        compiler_params=pltpu.CompilerParams(
            dimension_semantics=("parallel", "parallel", "arbitrary"),
            vmem_limit_bytes=vmem_limit,
        ),
        cost_estimate=cost,
    )(x2d, weight, b2d)

    if M_pad != M:
        out2d = out2d[:M]
    return out2d.reshape(*lead_shape, text_size)


if __name__ == "__main__":
    key = jax.random.PRNGKey(0)

    # ---- Case 1: small shapes consistent with the module's forward ----
    batch, seq, mm_size, text_size = 2, 8, 32, 64
    kx, kw, kb, key = jax.random.split(key, 4)
    bound = 1.0 / (mm_size ** 0.5)
    weight = jax.random.uniform(kw, (text_size, mm_size), jnp.float32,
                                minval=-bound, maxval=bound)
    bias = jax.random.uniform(kb, (text_size,), jnp.float32,
                              minval=-bound, maxval=bound)
    x = jax.random.normal(kx, (batch, seq, mm_size), jnp.float32)

    y = naive_linear(x, weight, bias)
    jax.block_until_ready(y)
    y_ref = x @ weight.T + bias
    assert y.shape == (batch, seq, text_size)
    assert jnp.allclose(y, y_ref, atol=1e-5, rtol=1e-5)

    # ---- Case 2: ragged M + 128-aligned N to exercise tiling/padding path ----
    batch2, seq2, mm2, text2 = 3, 50, 256, 384
    kx2, kw2, kb2, key = jax.random.split(key, 4)
    bound2 = 1.0 / (mm2 ** 0.5)
    weight2 = jax.random.uniform(kw2, (text2, mm2), jnp.float32,
                                 minval=-bound2, maxval=bound2)
    bias2 = jax.random.uniform(kb2, (text2,), jnp.float32,
                               minval=-bound2, maxval=bound2)
    x2 = jax.random.normal(kx2, (batch2, seq2, mm2), jnp.float32)

    y2 = naive_linear(x2, weight2, bias2)
    jax.block_until_ready(y2)
    y2_ref = x2 @ weight2.T + bias2
    assert y2.shape == (batch2, seq2, text2)
    assert jnp.allclose(y2, y2_ref, atol=1e-4, rtol=1e-4)

    print("KERNEL_OK")
</pallas_src>

<mosaic_0001>
module attributes {stable_mosaic.version = 11 : i64} {
  func.func @_linear_kernel(%arg0: i32, %arg1: i32, %arg2: i32, %arg3: memref<16x32xf32, #tpu.memory_space<vmem>>, %arg4: memref<64x32xf32, #tpu.memory_space<vmem>>, %arg5: memref<1x64xf32, #tpu.memory_space<vmem>>, %arg6: memref<16x64xf32, #tpu.memory_space<vmem>>, %arg7: memref<16x64xf32, #tpu.memory_space<vmem>>) attributes {dimension_semantics = [#tpu.dimension_semantics<parallel>, #tpu.dimension_semantics<parallel>, #tpu.dimension_semantics<arbitrary>], iteration_bounds = array<i64: 1, 1, 1>, scalar_prefetch = 0 : i64, scratch_operands = 1 : i64, tpu.core_type = #tpu.core_type<tc>, window_params = [{transform_indices = @transform_0, window_bounds = array<i64: 16, 32>}, {transform_indices = @transform_1, window_bounds = array<i64: 64, 32>}, {transform_indices = @transform_2, window_bounds = array<i64: 1, 64>}, {transform_indices = @transform_3, window_bounds = array<i64: 16, 64>}]} {
    %c0_i32 = arith.constant 0 : i32
    %0 = arith.cmpi eq, %arg2, %c0_i32 : i32
    %1 = arith.extui %0 : i1 to i32
    %c0_i32_0 = arith.constant 0 : i32
    %2 = arith.cmpi ne, %1, %c0_i32_0 : i32
    scf.if %2 {
      %cst_10 = arith.constant 0.000000e+00 : f32
      %12 = vector.broadcast %cst_10 : f32 to vector<16x64xf32>
      %c0_11 = arith.constant 0 : index
      %c0_12 = arith.constant 0 : index
      %13 = vector.load %arg7[%c0_11, %c0_12] : memref<16x64xf32, #tpu.memory_space<vmem>>, vector<16x64xf32>
      tpu.vector_store %arg7[%c0_11, %c0_12], %12 {strides = array<i32>} : memref<16x64xf32, #tpu.memory_space<vmem>>, vector<16x64xf32>,
    } else {
    }
    %c0 = arith.constant 0 : index
    %c0_1 = arith.constant 0 : index
    %3 = vector.load %arg7[%c0, %c0_1] : memref<16x64xf32, #tpu.memory_space<vmem>>, vector<16x64xf32>
    %c0_2 = arith.constant 0 : index
    %c0_3 = arith.constant 0 : index
    %4 = vector.load %arg3[%c0_2, %c0_3] : memref<16x32xf32, #tpu.memory_space<vmem>>, vector<16x32xf32>
    %c0_4 = arith.constant 0 : index
    %c0_5 = arith.constant 0 : index
    %5 = vector.load %arg4[%c0_4, %c0_5] : memref<64x32xf32, #tpu.memory_space<vmem>>, vector<64x32xf32>
    %cst = arith.constant dense<0.000000e+00> : vector<16x64xf32>
    %6 = tpu.matmul %4, %5, %cst {dimension_numbers = #tpu.dot_dimension_numbers<[1], [1], [0], [0], [0, 0, 1, 0], [], []>} : vector<16x32xf32>, vector<64x32xf32>, vector<16x64xf32> -> vector<16x64xf32>
    %7 = arith.addf %3, %6 : vector<16x64xf32>
    %c0_6 = arith.constant 0 : index
    %c0_7 = arith.constant 0 : index
    %8 = vector.load %arg7[%c0_6, %c0_7] : memref<16x64xf32, #tpu.memory_space<vmem>>, vector<16x64xf32>
    tpu.vector_store %arg7[%c0_6, %c0_7], %7 {strides = array<i32>} : memref<16x64xf32, #tpu.memory_space<vmem>>, vector<16x64xf32>,
    %c0_i32_8 = arith.constant 0 : i32
    %9 = arith.cmpi eq, %arg2, %c0_i32_8 : i32
    %10 = arith.extui %9 : i1 to i32
    %c0_i32_9 = arith.constant 0 : i32
    %11 = arith.cmpi ne, %10, %c0_i32_9 : i32
    scf.if %11 {
      %c0_10 = arith.constant 0 : index
      %c0_11 = arith.constant 0 : index
      %12 = vector.load %arg7[%c0_10, %c0_11] : memref<16x64xf32, #tpu.memory_space<vmem>>, vector<16x64xf32>
      %c0_12 = arith.constant 0 : index
      %c0_13 = arith.constant 0 : index
      %13 = vector.load %arg5[%c0_12, %c0_13] : memref<1x64xf32, #tpu.memory_space<vmem>>, vector<1x64xf32>
      %14 = vector.broadcast %13 : vector<1x64xf32> to vector<16x64xf32>
      %15 = arith.addf %12, %14 : vector<16x64xf32>
      %c0_14 = arith.constant 0 : index
      %c0_15 = arith.constant 0 : index
      %16 = vector.load %arg6[%c0_14, %c0_15] : memref<16x64xf32, #tpu.memory_space<vmem>>, vector<16x64xf32>
      tpu.vector_store %arg6[%c0_14, %c0_15], %15 {strides = array<i32>} : memref<16x64xf32, #tpu.memory_space<vmem>>, vector<16x64xf32>,
    } else {
    }
    return
  }
  func.func @transform_0(%arg0: i32, %arg1: i32, %arg2: i32) -> (i32, i32) {
    %c0_i32 = arith.constant 0 : i32
    return %arg0, %arg2 : i32, i32
  }
  func.func @transform_1(%arg0: i32, %arg1: i32, %arg2: i32) -> (i32, i32) {
    %c0_i32 = arith.constant 0 : i32
    return %arg1, %arg2 : i32, i32
  }
  func.func @transform_2(%arg0: i32, %arg1: i32, %arg2: i32) -> (i32, i32) {
    %c0_i32 = arith.constant 0 : i32
    %c0_i32_0 = arith.constant 0 : i32
    return %c0_i32, %arg1 : i32, i32
  }
  func.func @transform_3(%arg0: i32, %arg1: i32, %arg2: i32) -> (i32, i32) {
    %c0_i32 = arith.constant 0 : i32
    return %arg0, %arg1 : i32, i32
  }
}

</mosaic_0001>

<bundles_post_ra>
// kernel: tpu_custom_call.1
= control target key start
LH: loop header
LB: loop body
LE: loop exit
PB: predicated region body
PF: predicated region fallthrough
CT: control target
= control target key end

     0   :  { %vm34_vm0 = vcmask 261120   ;;  %vm19_vm1 = vcmask 523264   ;;  %v173_v1 = vmov 0.0   ;;  %s257_s0 = inlined_call_operand.vmem [shape: f32[16,32], index: 0, kind: input, shape index: {}]   ;;  %s258_s1 = inlined_call_operand.vmem [shape: f32[64,32], index: 1, kind: input, shape index: {}]   ;;  %s259_s2 = inlined_call_operand.vmem [shape: f32[1,64], index: 2, kind: input, shape index: {}]   ;;  %s260_s3 = inlined_call_operand.hbm [shape: f32[16,64], index: 3, kind: output, shape index: {}]  }
   0x1   :  { %v33_v0 = vld [vmem:[%s258_s1 + $0x38] sm:$0xff]  ;;  %20 = vst.msk [vmem:[#allocation2] sm:$0xff] %vm19_vm1, %v173_v1  ;;  %v32_v2 = vld [vmem:[%s258_s1 + $0x30] sm:$0xff] }
   0x2   :  { %124 = vmatpush.xpose.msk.msra.mxu0 %vm34_vm0, %v33_v0  ;;  %134 = vmatpush.xpose.msk.msra.mxu1 %vm34_vm0, %v33_v0  ;;  %21 = vst.msk [vmem:[#allocation2 + $0x8] sm:$0xff] %vm19_vm1, %v173_v1 }
   0x3   :  { %8 = vsyncpa [#allocation4], 0  ;;  %v31_v3 = vld [vmem:[%s258_s1 + $0x28] sm:$0xff]  ;;  %v30_v4 = vld [vmem:[%s258_s1 + $0x20] sm:$0xff]  ;;  %s174_s6 = smov [#allocation3]   ;;  %s112_s9 = sshll.u32 %s260_s3, 4  ;;  %s113_s9 = int_to_ptr.hbm [resolvable:$true] %s112_s9 }
   0x4   :  { %v29_v5 = vld [vmem:[%s258_s1 + $0x18] sm:$0xff]  ;;  %v28_v6 = vld [vmem:[%s258_s1 + $0x10] sm:$0xff]  ;;  %v27_v7 = vld [vmem:[%s258_s1 + $0x8] sm:$0xff]  ;;  %s175_s10 = smov 128   ;;  %s176_s11 = smov 8  }
   0x5   :  { %v26_v8 = vld [vmem:[%s258_s1] sm:$0xff]  ;;  %v25_v10 = vld [vmem:[%s257_s0 + $0x8] sm:$0xff] }
   0x6   :  { %125 = vmatpush.xpose.msk.msra.mxu0 %vm34_vm0, %v32_v2  ;;  %135 = vmatpush.xpose.msk.msra.mxu1 %vm34_vm0, %v32_v2  ;;  %v24_v9 = vld [vmem:[%s257_s0] sm:$0xff]  ;;  %s110_s0 = sshll.u32 %s174_s6, 4  ;;  %s111_s0 = int_to_ptr.vmem [resolvable:$true] %s110_s0 }
   0x7   :  { %v146_v17 = vld [vmem:[%s259_s2] ss:$0 sm:$0xff] }
   0x8   :  { %v22_v11 = vld [vmem:[#allocation2] sm:$0xff] }
   0x9   :  { %v23_v12 = vld [vmem:[#allocation2 + $0x8] sm:$0xff] }
   0xa   :  { %126 = vmatpush.xpose.msk.msra.mxu0 %vm34_vm0, %v31_v3  ;;  %136 = vmatpush.xpose.msk.msra.mxu1 %vm34_vm0, %v31_v3 }
   0xe   :  { %127 = vmatpush.xpose.msk.msra.mxu0 %vm34_vm0, %v30_v4  ;;  %137 = vmatpush.xpose.msk.msra.mxu1 %vm34_vm0, %v30_v4 }
  0x12   :  { %128 = vmatpush.xpose.msk.msra.mxu0 %vm34_vm0, %v29_v5  ;;  %138 = vmatpush.xpose.msk.msra.mxu1 %vm34_vm0, %v29_v5 }
  0x16   :  { %129 = vmatpush.xpose.msk.msra.mxu0 %vm34_vm0, %v28_v6  ;;  %139 = vmatpush.xpose.msk.msra.mxu1 %vm34_vm0, %v28_v6 }
  0x1a   :  { %130 = vmatpush.xpose.msk.msra.mxu0 %vm34_vm0, %v27_v7  ;;  %140 = vmatpush.xpose.msk.msra.mxu1 %vm34_vm0, %v27_v7 }
  0x1e   :  { %131 = vmatpush.xpose.msk.msra.mxu0 %vm34_vm0, %v26_v8  ;;  %141 = vmatpush.xpose.msk.msra.mxu1 %vm34_vm0, %v26_v8 }
  0x21   :  { %132 = vmatmul.msk.f32.vlgmr.msra.gmra.mxu0 %vm34_vm0, %v24_v9  ;;  %133 = vmatmul.msk.f32.vlgmr.msra.gmra.mxu1 %vm34_vm0, %v25_v10 }
  0x9e   :  { %v82_v13 = vpop.f32.mrf.mxu0  ;;  %v85_v14 = vpop.f32.mrf.mxu1 }
  0x9f   :  { %v88_v15 = vadd.f32 %v82_v13, %v22_v11  ;;  %v89_v16 = vadd.f32 %v85_v14, %v23_v12 }
  0xa1   :  { %91 = vst.msk [vmem:[#allocation2] sm:$0xff] %vm19_vm1, %v88_v15 }
  0xa2   :  { %92 = vst.msk [vmem:[#allocation2 + $0x8] sm:$0xff] %vm19_vm1, %v89_v16 }
  0xa8   :  { %v96_v18 = vld [vmem:[#allocation2] sm:$0xff] }
  0xa9   :  { %v97_v19 = vld [vmem:[#allocation2 + $0x8] sm:$0xff]  ;;  %v102_v20 = vadd.f32 %v146_v17, %v96_v18 }
  0xaa   :  { %v103_v21 = vadd.f32 %v146_v17, %v97_v19 }
  0xab   :  { %104 = vst.msk [vmem:[#allocation3] sm:$0xff] %vm19_vm1, %v102_v20 }
  0xac   :  { %105 = vst.msk [vmem:[#allocation3 + $0x8] sm:$0xff] %vm19_vm1, %v103_v21 }
  0xad   :  { %118 = dma.vmem_to_hbm [thread:$0]  %s111_s0, 256, %s113_s9, [#allocation4], %s175_s10, %s175_s10, %s176_s11  }
  0xae   :  { %171 = dma.done.wait [#allocation4], 256  }
  0xaf   :  { %172 = vsyncadd [#allocation4], 4294967040 }
  0xb0   :  { %123 = vsyncpa [#allocation4], 1 }

</bundles_post_ra>
